<compile_context>
chip_gen: v5e
topology: v5e:2x2
jax: 0.10.0
libtpu: 0.0.40
codegen_flags: <defaults>
</compile_context>

<pallas_src>
import numpy as np
import jax
import jax.numpy as jnp
from jax.experimental import pallas as pl
from jax.experimental.pallas import tpu as pltpu

NUM_LAYERS = 4


def _round_up(x, m):
    return ((x + m - 1) // m) * m


def gcn_kernel(a_ref, x_ref, w_ref, b_ref, p_ref, out_ref, h_ref, xw_ref, acc_ref):
    """Fused L-layer GCN + ReLU + global mean pool.

    Grid: (layer l, dst node tile i, src node tile k)   -- row-major, k innermost.

    a_ref  : [TM, TK]    bf16  A_agg tile  (A_agg[dst, src] = #edges src->dst), streamed
    x_ref  : [N_pad, F]  bf16  initial node features (resident)
    w_ref  : [1, F, F]   bf16  W of current layer
    b_ref  : [1, 1, F]   f32   bias of current layer
    p_ref  : [G_pad, TM] f32   mean-pool columns for this dst tile
    out_ref: [G_pad, F]  f32   pooled output (resident accumulator)
    h_ref  : [N_pad, F]  bf16  scratch: current node features
    xw_ref : [N_pad, F]  bf16  scratch: H @ W cache for the current layer
    acc_ref: [TM, F]     f32   scratch: per-dst-tile aggregation accumulator
    """
    l = pl.program_id(0)
    i = pl.program_id(1)
    k = pl.program_id(2)
    num_l = pl.num_programs(0)
    num_k = pl.num_programs(2)

    TM = acc_ref.shape[0]
    TK = a_ref.shape[1]

    # Very first grid step: load initial features into the resident H scratch and
    # zero the pooled-output accumulator.
    @pl.when((l == 0) & (i == 0) & (k == 0))
    def _():
        h_ref[...] = x_ref[...]
        out_ref[...] = jnp.zeros_like(out_ref)

    # On the first dst tile of each layer, compute XW for this src tile once and
    # cache it; all subsequent dst tiles of the layer reuse it (H @ W done once/layer).
    row_k = pl.multiple_of(k * TK, TK)

    @pl.when(i == 0)
    def _():
        xw_ref[pl.ds(row_k, TK), :] = jnp.dot(
            h_ref[pl.ds(row_k, TK), :], w_ref[0],
            preferred_element_type=jnp.float32).astype(xw_ref.dtype)

    # Zero the dst-tile accumulator at the start of the src reduction.
    @pl.when(k == 0)
    def _():
        acc_ref[...] = jnp.zeros_like(acc_ref)

    # Aggregation: acc += A[dst_tile, src_tile] @ XW[src_tile]   (bf16 x bf16 -> f32 MXU)
    acc_ref[...] += jnp.dot(a_ref[...], xw_ref[pl.ds(row_k, TK), :],
                            preferred_element_type=jnp.float32)

    # End of the src reduction: f32 epilogue (bias + ReLU) on the VPU, write next-layer
    # features; on the final layer also accumulate the mean pool for this dst tile.
    @pl.when(k == num_k - 1)
    def _():
        h_f32 = jnp.maximum(acc_ref[...] + b_ref[0], 0.0)
        row_i = pl.multiple_of(i * TM, TM)
        h_ref[pl.ds(row_i, TM), :] = h_f32.astype(h_ref.dtype)

        @pl.when(l == num_l - 1)
        def _():
            out_ref[...] += jnp.dot(p_ref[...], h_f32,
                                    preferred_element_type=jnp.float32)


def gcn_net1_forward(x, adj, pool, weights, biases):
    """x: [N, F] f32, adj: [N, N] f32 (edge counts), pool: [G, N] f32 mean-pool matrix,
    weights: [L, F, F] f32 (stored as (in, out)), biases: [L, 1, F] f32."""
    N, F = x.shape
    L = weights.shape[0]
    G = pool.shape[0]

    # Pad node dim to a lane/MXU-friendly multiple; graph dim to a sublane multiple.
    N_pad = _round_up(N, 128)
    tile = 256 if (N_pad % 256 == 0) else 128   # fill the 256x256 MXU on v6e/v7x when possible
    G_pad = _round_up(G, 8)

    # bf16 MXU inputs (A's small integer multiplicities are exact in bf16); zero padding
    # keeps padded rows/cols numerically inert.
    x_p = jnp.zeros((N_pad, F), jnp.bfloat16).at[:N, :].set(x.astype(jnp.bfloat16))
    a_p = jnp.zeros((N_pad, N_pad), jnp.bfloat16).at[:N, :N].set(adj.astype(jnp.bfloat16))
    p_p = jnp.zeros((G_pad, N_pad), jnp.float32).at[:G, :N].set(pool.astype(jnp.float32))
    w_b = weights.astype(jnp.bfloat16)
    b_f = biases.astype(jnp.float32)

    n_dst = N_pad // tile
    n_src = N_pad // tile
    grid = (L, n_dst, n_src)

    flops = L * (2 * N_pad * F * F + 2 * N_pad * N_pad * F) + 2 * G_pad * N_pad * F
    bytes_accessed = (L * N_pad * N_pad * 2          # A streamed once per layer
                      + N_pad * F * 2                # x
                      + L * F * F * 2 + L * F * 4    # W, b
                      + L * n_dst * G_pad * tile * 4 # P tiles
                      + G_pad * F * 4)               # output

    out = pl.pallas_call(
        gcn_kernel,
        out_shape=jax.ShapeDtypeStruct((G_pad, F), jnp.float32),
        grid_spec=pltpu.PrefetchScalarGridSpec(
            num_scalar_prefetch=0,
            grid=grid,
            in_specs=[
                pl.BlockSpec((tile, tile), lambda l, i, k: (i, k)),   # A tile (streamed/pipelined)
                pl.BlockSpec((N_pad, F), lambda l, i, k: (0, 0)),     # x (resident, fetched once)
                pl.BlockSpec((1, F, F), lambda l, i, k: (l, 0, 0)),   # W[l]
                pl.BlockSpec((1, 1, F), lambda l, i, k: (l, 0, 0)),   # b[l]
                pl.BlockSpec((G_pad, tile), lambda l, i, k: (0, i)),  # P[:, dst tile]
            ],
            out_specs=pl.BlockSpec((G_pad, F), lambda l, i, k: (0, 0)),
            scratch_shapes=[
                pltpu.VMEM((N_pad, F), jnp.bfloat16),   # H
                pltpu.VMEM((N_pad, F), jnp.bfloat16),   # XW cache
                pltpu.VMEM((tile, F), jnp.float32),     # dst-tile f32 accumulator
            ],
        ),
        compiler_params=pltpu.CompilerParams(
            # H/XW scratch is carried across dst tiles and layers -> no parallel axes
            # in this single fused call (v7x megacore would need per-layer calls).
            dimension_semantics=("arbitrary", "arbitrary", "arbitrary"),
        ),
        cost_estimate=pl.CostEstimate(flops=flops, transcendentals=0,
                                      bytes_accessed=bytes_accessed),
    )(a_p, x_p, w_b, b_f, p_p)
    return out[:G]


if __name__ == "__main__":
    key = jax.random.PRNGKey(0)

    # Small synthetic "data" object: 2 graphs x 32 nodes, 128-dim features.
    G = 2
    N_per_graph = 32
    N = G * N_per_graph
    E_per_graph = 96
    in_dim = 128
    hidden = 128

    k_x, k_e, k_w, k_b = jax.random.split(key, 4)

    # data.x
    x = jax.random.normal(k_x, (N, in_dim), dtype=jnp.float32)

    # data.edge_index : random intra-graph directed edges, shape (2, E)
    edge_chunks = []
    ek = k_e
    for g in range(G):
        ek, sk = jax.random.split(ek)
        src = jax.random.randint(sk, (E_per_graph,), 0, N_per_graph) + g * N_per_graph
        ek, dk = jax.random.split(ek)
        dst = jax.random.randint(dk, (E_per_graph,), 0, N_per_graph) + g * N_per_graph
        edge_chunks.append(jnp.stack([src, dst]))
    edge_index = jnp.concatenate(edge_chunks, axis=1)  # (2, E)

    # Glue: densify edge_index into the aggregation matrix (sum at target node).
    A = jnp.zeros((N, N), jnp.float32).at[edge_index[1], edge_index[0]].add(1.0)

    # data.batch and mean-pool matrix P (G, N)
    batch = jnp.repeat(jnp.arange(G), N_per_graph)
    counts = jnp.bincount(batch, length=G).astype(jnp.float32)
    P = (jax.nn.one_hot(batch, G, dtype=jnp.float32) / counts[None, :]).T

    # Deterministic parameter init (glorot-uniform weights like PyG; small random bias
    # to exercise the bias-broadcast path — PyG initializes bias to zero).
    dims = [in_dim] + [hidden] * NUM_LAYERS
    ws, bs = [], []
    wk, bk = k_w, k_b
    for l in range(NUM_LAYERS):
        wk, sk = jax.random.split(wk)
        fan_in, fan_out = dims[l], dims[l + 1]
        limit = float(np.sqrt(6.0 / (fan_in + fan_out)))
        ws.append(jax.random.uniform(sk, (fan_in, fan_out), jnp.float32, -limit, limit))
        bk, sbk = jax.random.split(bk)
        bs.append(0.01 * jax.random.normal(sbk, (1, fan_out), dtype=jnp.float32))
    W = jnp.stack(ws)  # (L, 128, 128)
    B = jnp.stack(bs)  # (L, 1, 128)

    out = gcn_net1_forward(x, A, P, W, B)
    out = jax.block_until_ready(out)

    # Pure-JAX f32 reference (kernel uses bf16 MXU inputs with f32 accumulation,
    # so compare with a loosened, bf16-appropriate tolerance).
    h = x
    for l in range(NUM_LAYERS):
        h = jnp.maximum(A @ (h @ W[l]) + B[l], 0.0)
    ref = P @ h
    np.testing.assert_allclose(np.asarray(out), np.asarray(ref), rtol=5e-2, atol=5e-2)

    print("KERNEL_OK")
</pallas_src>

<mosaic_0001>
module attributes {stable_mosaic.version = 11 : i64} {
  func.func @gcn_kernel(%arg0: i32, %arg1: i32, %arg2: i32, %arg3: memref<128x128xbf16, #tpu.memory_space<vmem>>, %arg4: memref<128x128xbf16, #tpu.memory_space<vmem>>, %arg5: memref<1x128x128xbf16, #tpu.memory_space<vmem>>, %arg6: memref<1x1x128xf32, #tpu.memory_space<vmem>>, %arg7: memref<8x128xf32, #tpu.memory_space<vmem>>, %arg8: memref<8x128xf32, #tpu.memory_space<vmem>>, %arg9: memref<128x128xbf16, #tpu.memory_space<vmem>>, %arg10: memref<128x128xbf16, #tpu.memory_space<vmem>>, %arg11: memref<128x128xf32, #tpu.memory_space<vmem>>) attributes {dimension_semantics = [#tpu.dimension_semantics<arbitrary>, #tpu.dimension_semantics<arbitrary>, #tpu.dimension_semantics<arbitrary>], iteration_bounds = array<i64: 4, 1, 1>, scalar_prefetch = 0 : i64, scratch_operands = 3 : i64, tpu.core_type = #tpu.core_type<tc>, window_params = [{transform_indices = @transform_0, window_bounds = array<i64: 128, 128>}, {pipeline_mode = #tpu.pipeline_mode<synchronous>, transform_indices = @transform_1, window_bounds = array<i64: 128, 128>}, {transform_indices = @transform_2, window_bounds = array<i64: 1, 128, 128>}, {transform_indices = @transform_3, window_bounds = array<i64: 1, 1, 128>}, {transform_indices = @transform_4, window_bounds = array<i64: 8, 128>}, {pipeline_mode = #tpu.pipeline_mode<synchronous>, transform_indices = @transform_5, window_bounds = array<i64: 8, 128>}]} {
    %c0_i32 = arith.constant 0 : i32
    %0 = arith.cmpi eq, %arg0, %c0_i32 : i32
    %c0_i32_0 = arith.constant 0 : i32
    %1 = arith.cmpi eq, %arg1, %c0_i32_0 : i32
    %2 = arith.andi %0, %1 : i1
    %c0_i32_1 = arith.constant 0 : i32
    %3 = arith.cmpi eq, %arg2, %c0_i32_1 : i32
    %4 = arith.andi %2, %3 : i1
    %5 = arith.extui %4 : i1 to i32
    %c0_i32_2 = arith.constant 0 : i32
    %6 = arith.cmpi ne, %5, %c0_i32_2 : i32
    scf.if %6 {
      %c0_15 = arith.constant 0 : index
      %c0_16 = arith.constant 0 : index
      %25 = vector.load %arg4[%c0_15, %c0_16] : memref<128x128xbf16, #tpu.memory_space<vmem>>, vector<128x128xbf16>
      %c0_17 = arith.constant 0 : index
      %c0_18 = arith.constant 0 : index
      %26 = vector.load %arg9[%c0_17, %c0_18] : memref<128x128xbf16, #tpu.memory_space<vmem>>, vector<128x128xbf16>
      tpu.vector_store %arg9[%c0_17, %c0_18], %25 {strides = array<i32>} : memref<128x128xbf16, #tpu.memory_space<vmem>>, vector<128x128xbf16>,
      %cst_19 = arith.constant 0.000000e+00 : f32
      %27 = vector.broadcast %cst_19 : f32 to vector<8x128xf32>
      %c0_20 = arith.constant 0 : index
      %c0_21 = arith.constant 0 : index
      %28 = vector.load %arg8[%c0_20, %c0_21] : memref<8x128xf32, #tpu.memory_space<vmem>>, vector<8x128xf32>
      tpu.vector_store %arg8[%c0_20, %c0_21], %27 {strides = array<i32>} : memref<8x128xf32, #tpu.memory_space<vmem>>, vector<8x128xf32>,
    } else {
    }
    %c128_i32 = arith.constant 128 : i32
    %7 = arith.muli %arg2, %c128_i32 : i32
    %8 = tpu.assume_multiple %7, 128 : i32
    %c0_i32_3 = arith.constant 0 : i32
    %9 = arith.cmpi eq, %arg1, %c0_i32_3 : i32
    %10 = arith.extui %9 : i1 to i32
    %c0_i32_4 = arith.constant 0 : i32
    %11 = arith.cmpi ne, %10, %c0_i32_4 : i32
    scf.if %11 {
      %25 = arith.index_cast %8 : i32 to index
      %c0_15 = arith.constant 0 : index
      %26 = vector.load %arg9[%25, %c0_15] : memref<128x128xbf16, #tpu.memory_space<vmem>>, vector<128x128xbf16>
      %c0_16 = arith.constant 0 : index
      %c0_17 = arith.constant 0 : index
      %c0_18 = arith.constant 0 : index
      %27 = vector.load %arg5[%c0_16, %c0_17, %c0_18] : memref<1x128x128xbf16, #tpu.memory_space<vmem>>, vector<1x128x128xbf16>
      %28 = vector.shape_cast %27 : vector<1x128x128xbf16> to vector<128x128xbf16>
      %cst_19 = arith.constant dense<0.000000e+00> : vector<128x128xf32>
      %29 = tpu.matmul %26, %28, %cst_19 {dimension_numbers = #tpu.dot_dimension_numbers<[1], [0], [0], [1], [0, 0, 1, 1], [], []>} : vector<128x128xbf16>, vector<128x128xbf16>, vector<128x128xf32> -> vector<128x128xf32>
      %30 = arith.truncf %29 : vector<128x128xf32> to vector<128x128xbf16>
      %31 = arith.index_cast %8 : i32 to index
      %c0_20 = arith.constant 0 : index
      %32 = vector.load %arg10[%31, %c0_20] : memref<128x128xbf16, #tpu.memory_space<vmem>>, vector<128x128xbf16>
      tpu.vector_store %arg10[%31, %c0_20], %30 {strides = array<i32>} : memref<128x128xbf16, #tpu.memory_space<vmem>>, vector<128x128xbf16>,
    } else {
    }
    %c0_i32_5 = arith.constant 0 : i32
    %12 = arith.cmpi eq, %arg2, %c0_i32_5 : i32
    %13 = arith.extui %12 : i1 to i32
    %c0_i32_6 = arith.constant 0 : i32
    %14 = arith.cmpi ne, %13, %c0_i32_6 : i32
    scf.if %14 {
      %cst_15 = arith.constant 0.000000e+00 : f32
      %25 = vector.broadcast %cst_15 : f32 to vector<128x128xf32>
      %c0_16 = arith.constant 0 : index
      %c0_17 = arith.constant 0 : index
      %26 = vector.load %arg11[%c0_16, %c0_17] : memref<128x128xf32, #tpu.memory_space<vmem>>, vector<128x128xf32>
      tpu.vector_store %arg11[%c0_16, %c0_17], %25 {strides = array<i32>} : memref<128x128xf32, #tpu.memory_space<vmem>>, vector<128x128xf32>,
    } else {
    }
    %c0 = arith.constant 0 : index
    %c0_7 = arith.constant 0 : index
    %15 = vector.load %arg11[%c0, %c0_7] : memref<128x128xf32, #tpu.memory_space<vmem>>, vector<128x128xf32>
    %c0_8 = arith.constant 0 : index
    %c0_9 = arith.constant 0 : index
    %16 = vector.load %arg3[%c0_8, %c0_9] : memref<128x128xbf16, #tpu.memory_space<vmem>>, vector<128x128xbf16>
    %17 = arith.index_cast %8 : i32 to index
    %c0_10 = arith.constant 0 : index
    %18 = vector.load %arg10[%17, %c0_10] : memref<128x128xbf16, #tpu.memory_space<vmem>>, vector<128x128xbf16>
    %cst = arith.constant dense<0.000000e+00> : vector<128x128xf32>
    %19 = tpu.matmul %16, %18, %cst {dimension_numbers = #tpu.dot_dimension_numbers<[1], [0], [0], [1], [0, 0, 1, 1], [], []>} : vector<128x128xbf16>, vector<128x128xbf16>, vector<128x128xf32> -> vector<128x128xf32>
    %20 = arith.addf %15, %19 : vector<128x128xf32>
    %c0_11 = arith.constant 0 : index
    %c0_12 = arith.constant 0 : index
    %21 = vector.load %arg11[%c0_11, %c0_12] : memref<128x128xf32, #tpu.memory_space<vmem>>, vector<128x128xf32>
    tpu.vector_store %arg11[%c0_11, %c0_12], %20 {strides = array<i32>} : memref<128x128xf32, #tpu.memory_space<vmem>>, vector<128x128xf32>,
    %c0_i32_13 = arith.constant 0 : i32
    %22 = arith.cmpi eq, %arg2, %c0_i32_13 : i32
    %23 = arith.extui %22 : i1 to i32
    %c0_i32_14 = arith.constant 0 : i32
    %24 = arith.cmpi ne, %23, %c0_i32_14 : i32
    scf.if %24 {
      %c0_15 = arith.constant 0 : index
      %c0_16 = arith.constant 0 : index
      %25 = vector.load %arg11[%c0_15, %c0_16] : memref<128x128xf32, #tpu.memory_space<vmem>>, vector<128x128xf32>
      %c0_17 = arith.constant 0 : index
      %c0_18 = arith.constant 0 : index
      %c0_19 = arith.constant 0 : index
      %26 = vector.load %arg6[%c0_17, %c0_18, %c0_19] : memref<1x1x128xf32, #tpu.memory_space<vmem>>, vector<1x1x128xf32>
      %27 = vector.shape_cast %26 : vector<1x1x128xf32> to vector<1x128xf32>
      %28 = vector.broadcast %27 : vector<1x128xf32> to vector<128x128xf32>
      %29 = arith.addf %25, %28 : vector<128x128xf32>
      %cst_20 = arith.constant 0.000000e+00 : f32
      %30 = vector.broadcast %cst_20 : f32 to vector<128x128xf32>
      %31 = arith.maximumf %29, %30 : vector<128x128xf32>
      %c128_i32_21 = arith.constant 128 : i32
      %32 = arith.muli %arg1, %c128_i32_21 : i32
      %33 = tpu.assume_multiple %32, 128 : i32
      %34 = arith.truncf %31 : vector<128x128xf32> to vector<128x128xbf16>
      %35 = arith.index_cast %33 : i32 to index
      %c0_22 = arith.constant 0 : index
      %36 = vector.load %arg9[%35, %c0_22] : memref<128x128xbf16, #tpu.memory_space<vmem>>, vector<128x128xbf16>
      tpu.vector_store %arg9[%35, %c0_22], %34 {strides = array<i32>} : memref<128x128xbf16, #tpu.memory_space<vmem>>, vector<128x128xbf16>,
      %c3_i32 = arith.constant 3 : i32
      %37 = arith.cmpi eq, %arg0, %c3_i32 : i32
      %38 = arith.extui %37 : i1 to i32
      %c0_i32_23 = arith.constant 0 : i32
      %39 = arith.cmpi ne, %38, %c0_i32_23 : i32
      scf.if %39 {
        %c0_24 = arith.constant 0 : index
        %c0_25 = arith.constant 0 : index
        %40 = vector.load %arg8[%c0_24, %c0_25] : memref<8x128xf32, #tpu.memory_space<vmem>>, vector<8x128xf32>
        %c0_26 = arith.constant 0 : index
        %c0_27 = arith.constant 0 : index
        %41 = vector.load %arg7[%c0_26, %c0_27] : memref<8x128xf32, #tpu.memory_space<vmem>>, vector<8x128xf32>
        %cst_28 = arith.constant dense<0.000000e+00> : vector<8x128xf32>
        %42 = tpu.matmul %41, %31, %cst_28 {dimension_numbers = #tpu.dot_dimension_numbers<[1], [0], [0], [1], [0, 0, 1, 1], [], []>} : vector<8x128xf32>, vector<128x128xf32>, vector<8x128xf32> -> vector<8x128xf32>
        %43 = arith.addf %40, %42 : vector<8x128xf32>
        %c0_29 = arith.constant 0 : index
        %c0_30 = arith.constant 0 : index
        %44 = vector.load %arg8[%c0_29, %c0_30] : memref<8x128xf32, #tpu.memory_space<vmem>>, vector<8x128xf32>
        tpu.vector_store %arg8[%c0_29, %c0_30], %43 {strides = array<i32>} : memref<8x128xf32, #tpu.memory_space<vmem>>, vector<8x128xf32>,
      } else {
      }
    } else {
    }
    return
  }
  func.func @transform_0(%arg0: i32, %arg1: i32, %arg2: i32) -> (i32, i32) {
    %c0_i32 = arith.constant 0 : i32
    return %arg1, %arg2 : i32, i32
  }
  func.func @transform_1(%arg0: i32, %arg1: i32, %arg2: i32) -> (i32, i32) {
    %c0_i32 = arith.constant 0 : i32
    %c0_i32_0 = arith.constant 0 : i32
    %c0_i32_1 = arith.constant 0 : i32
    return %c0_i32, %c0_i32_0 : i32, i32
  }
  func.func @transform_2(%arg0: i32, %arg1: i32, %arg2: i32) -> (i32, i32, i32) {
    %c0_i32 = arith.constant 0 : i32
    %c0_i32_0 = arith.constant 0 : i32
    %c0_i32_1 = arith.constant 0 : i32
    return %arg0, %c0_i32, %c0_i32_0 : i32, i32, i32
  }
  func.func @transform_3(%arg0: i32, %arg1: i32, %arg2: i32) -> (i32, i32, i32) {
    %c0_i32 = arith.constant 0 : i32
    %c0_i32_0 = arith.constant 0 : i32
    %c0_i32_1 = arith.constant 0 : i32
    return %arg0, %c0_i32, %c0_i32_0 : i32, i32, i32
  }
  func.func @transform_4(%arg0: i32, %arg1: i32, %arg2: i32) -> (i32, i32) {
    %c0_i32 = arith.constant 0 : i32
    %c0_i32_0 = arith.constant 0 : i32
    return %c0_i32, %arg1 : i32, i32
  }
  func.func @transform_5(%arg0: i32, %arg1: i32, %arg2: i32) -> (i32, i32) {
    %c0_i32 = arith.constant 0 : i32
    %c0_i32_0 = arith.constant 0 : i32
    %c0_i32_1 = arith.constant 0 : i32
    return %c0_i32, %c0_i32_0 : i32, i32
  }
}

</mosaic_0001>

<bundles_post_ra>
// kernel: tpu_custom_call.1
= control target key start
LH: loop header
LB: loop body
LE: loop exit
PB: predicated region body
PF: predicated region fallthrough
CT: control target
= control target key end

     0   :  { %s1975_s0 = inlined_call_operand.hbm [shape: bf16[128,128], index: 0, kind: input, shape index: {}]   ;;  %s1976_s1 = inlined_call_operand.hbm [shape: bf16[128,128], index: 1, kind: input, shape index: {}]   ;;  %s1977_s2 = inlined_call_operand.hbm [shape: bf16[4,128,128], index: 2, kind: input, shape index: {}]   ;;  %s1978_s3 = inlined_call_operand.hbm [shape: f32[4,1,128], index: 3, kind: input, shape index: {}]   ;;  %s1979_s4 = inlined_call_operand.hbm [shape: f32[8,128], index: 4, kind: input, shape index: {}]   ;;  %s1980_s5 = inlined_call_operand.hbm [shape: f32[8,128], index: 5, kind: output, shape index: {}]  }
   0x1   :  { %1983 = sst [smem:[#allocation19_spill]] %s1975_s0 }
   0x2   :  { %1984 = sst [smem:[#allocation20_spill]] %s1976_s1 }
   0x3   :  { %1985 = sst [smem:[#allocation21_spill]] %s1977_s2 }
   0x4   :  { %10 = vsyncpa [#allocation6], 0 }
   0x5   :  { %11 = vsyncpa [#allocation9], 0 }
   0x6   :  { %12 = vsyncpa [#allocation7], 0  ;;  %s1785_s18 = smov 0   ;;  %s1787_s19 = smov 0  }
   0x7   :  { %s1789_s20 = smov 0   ;;  %s1791_s21 = smov 0  }
   0x8   :  { %s1793_s22 = smov 0   ;;  %s1795_s23 = smov 0  }
   0x9 LB: > { %s1814_s24 = sadd.s32 4294967295, %s1746_s23   ;;  %p106_p0 = scmp.ne.s32.totalorder %s1730_s19, %s1726_s18  ;;  %s1746_s23 = sphi %s1795_s23, %s18_s23   ;;  %s1742_s22 = sphi %s1793_s22, %s2000_s22   ;;  %s1738_s21 = sphi %s1791_s21, %s1999_s21   ;;  %s1734_s20 = sphi %s1789_s20, %s1998_s20   ;;  %s1730_s19 = sphi %s1787_s19, %s1997_s19   ;;  %s1726_s18 = sphi %s1785_s18, %s1996_s18  }
   0xa   : > { %p107_p1 = scmp.eq.s32.totalorder %s1814_s24, 0  ;;  %p1107_p2 = scmp.ge.s32.totalorder %s1746_s23, 1 }
   0xb   : > { %p190_p3 = scmp.lt.s32.totalorder %s1746_s23, 5  ;;  %s1987_s0 = sld [smem:[#allocation19_spill]] }
   0xc   : > { %p1822_p4 = por %p107_p1, %p106_p0  ;;  %s1748_s30 = smov [#allocation5]  }
   0xd   : > { %p1829_p5 = pnand %p1107_p2, %p190_p3  ;;  %s207_s6 = sshll.u32 %s1748_s30, 4  ;;  %s208_s6 = int_to_ptr.vmem [resolvable:$true] %s207_s6 }
   0xe   : > { %s1990_s1 = sld [smem:[#allocation20_spill]]  ;;  %s1981_s11 = smov 64  }
   0xf   : > { %p1420_p6 = pneg %p1829_p5  ;;  %s1982_s12 = smov 4  }
  0x10   : > { %s1751_s13 = smov [#allocation8]   ;;  %s37_s15 = sadd.s32 1, %s1742_s22 }
  0x11   : > { %s205_s28 = sshll.u32 %s1987_s0, 4  ;;  %p1837_p7 = pnand %p1420_p6, %p107_p1  ;;  %s206_s28 = int_to_ptr.hbm [resolvable:$true] %s205_s28 }
  0x12   : > { %s221_s14 = sshll.u32 %s1751_s13, 4  ;;  %s93_s16 = sadd.s32 1, %s1734_s20  ;;  %s222_s14 = int_to_ptr.vmem [resolvable:$true] %s221_s14 }
  0x13   : > { %1423 = dma.hbm_to_vmem [thread:$0]  (!%p1837_p7), %s206_s28, 1024, %s208_s6, [#allocation6], %s1981_s11, %s1981_s11, %s1982_s12  }
  0x14   : > { %s219_s10 = sshll.u32 %s1990_s1, 4  ;;  %p39_p8 = scmp.ge.s32.totalorder %s37_s15, 4  ;;  %s220_s10 = int_to_ptr.hbm [resolvable:$true] %s219_s10 }
  0x15   : > { %1426 = dma.hbm_to_vmem [thread:$0]  (!%p1837_p7), %s220_s10, 1024, %s222_s14, [#allocation9], %s1981_s11, %s1981_s11, %s1982_s12  }
  0x16   : > { %p100_p9 = scmp.ne.s32.totalorder %s1734_s20, %s1730_s19  ;;  %p101_p10 = scmp.eq.s32.totalorder %s1746_s23, 0 }
  0x17   : > { %p1440_p11 = scmp.lt.s32.totalorder %s1746_s23, 4  ;;  %s2002_s15 = smov (%p39_p8, %s37_s15), 0 }
  0x18   : > { %p1862_p12 = por %p101_p10, %p100_p9  ;;  %s249_s18 = sand.u32 1, %s1746_s23  }
  0x19   : > { %s90_s26 = ssub.s32 %s1742_s22, %s2002_s15  ;;  %s251_s27 = sand.u32 1, %s1734_s20  }
  0x1a   : > { %p91_p13 = scmp.eq.s32.totalorder %s90_s26, 0  ;;  %s1112_s28 = sshll.u32 %s251_s27, 6 }
  0x1b   : > { %s1255_s30 = sshll.u32 %s1742_s22, 6  ;;  %s1992_s2 = sld [smem:[#allocation21_spill]] }
  0x1c   : > { %s1872_s6 = scalar_select %p91_p13, %s1734_s20, %s93_s16  }
  0x1d   : > { %s253_s14 = scalar_lea.vmem [#allocation10], %s1112_s28  ;;  %p1881_p0 = pnand %p1440_p11, %p1862_p12 }
  0x1e   : > { %s261_s11 = sshll.u32 %s253_s14, 4  ;;  %s236_s16 = sshll.u32 %s1979_s4, 4  ;;  %s262_s11 = int_to_ptr.vmem [resolvable:$true] %s261_s11  ;;  %s237_s16 = int_to_ptr.hbm [resolvable:$true] %s236_s16 }
  0x1f   : > { %s1752_s8 = smov [#allocation12]   ;;  %s250_s9 = scalar_lea.sflag [#allocation6], %s249_s18 }
  0x20   : > { %s1994_s28 = smov 4   ;;  %s277_s1 = scalar_lea.hbm %s1978_s3, %s1742_s22 }
  0x21   : > { %s258_s10 = scalar_lea.hbm %s1992_s2, %s1255_s30  ;;  %s238_s30 = sshll.u32 %s1752_s8, 4  ;;  %s239_s30 = int_to_ptr.vmem [resolvable:$true] %s238_s30 }
  0x22   : > { %s259_s13 = sshll.u32 %s258_s10, 4  ;;  %s1995_s10 = smov 64   ;;  %s260_s13 = int_to_ptr.hbm [resolvable:$true] %s259_s13 }
  0x23   : > { %1433 = dma.hbm_to_vmem [thread:$0]  (!%p1881_p0), %s260_s13, 1024, %s262_s11, %s250_s9, %s1995_s10, %s1995_s10, %s1994_s28  }
  0x24   : > { %1429 = dma.hbm_to_vmem [thread:$0]  (!%p1837_p7), %s237_s16, 128, %s239_s30, [#allocation9]  }
  0x25   : > { %s274_s0 = scalar_lea.vmem [#allocation11], %s251_s27  ;;  %s279_s2 = sshll.u32 %s277_s1, 4  ;;  %s280_s2 = int_to_ptr.hbm [resolvable:$true] %s279_s2 }
  0x26   : > { %s281_s12 = sshll.u32 %s274_s0, 4  ;;  %290 = sbr.rel (%p1829_p5) target bundleno = 685 (0x2ad), region = 40  ;;  %s282_s12 = int_to_ptr.vmem [resolvable:$true] %s281_s12 }
  0x27   : > { %1436 = dma.hbm_to_vmem [thread:$0]  (!%p1881_p0), %s280_s2, 16, %s282_s12, %s250_s9  }
  0x2b   : > { %1705 = dma.done.wait (%p107_p1), [#allocation6], 1024  }
  0x2c   : > { %1707 = vsyncadd (%p107_p1), [#allocation6], 4294966272 }
  0x2d   : > { %1709 = dma.done.wait (%p107_p1), [#allocation9], 1024  }
  0x2e   : > { %1711 = vsyncadd (%p107_p1), [#allocation9], 4294966272  ;;  %s302_s1 = sand.u32 1, %s1814_s24   ;;  %s304_s2 = sand.u32 1, %s1730_s19  }
  0x2f   : > { %s1118_s7 = sshll.u32 %s304_s2, 6  ;;  %s303_s29 = scalar_lea.sflag [#allocation6], %s302_s1 }
  0x30   : > { %s1913_s11 = scalar_lea.vmem [#allocation10], %s1118_s7 }
  0x31   : > { %1713 = dma.done.wait (%p1822_p4), %s303_s29, 1040  }
  0x32   : > { %1715 = vsyncadd (%p1822_p4), %s303_s29, 4294966256  ;;  %s1919_s18 = scalar_lea.vmem [#allocation11], %s304_s2 }
  0x33   : > { %1717 = dma.done.wait (%p107_p1), [#allocation9], 128  }
  0x34   : > { %1719 = vsyncadd (%p107_p1), [#allocation9], 4294967168  ;;  %p348_p2 = scmp.eq.s32.totalorder %s1738_s21, 0 }
  0x35   : > { %v357_v0 = vld [vmem:[#allocation8] sm:$0xff] (%p348_p2)   ;;  %v359_v1 = vld [vmem:[#allocation8 + $0x8] sm:$0xff] (%p348_p2)   ;;  %v361_v2 = vld [vmem:[#allocation8 + $0x10] sm:$0xff] (%p348_p2)   ;;  %v1753_v8 = vmov (%p348_p2), 0.0  }
  0x36   : > { %356 = sbr.rel (!%p348_p2) target bundleno = 63 (0x3f), region = 64  ;;  %373 = vst [vmem:[#allocation2] sm:$0xff] (%p348_p2), %v357_v0   ;;  %v363_v3 = vld [vmem:[#allocation8 + $0x18] sm:$0xff] (%p348_p2)   ;;  %v365_v4 = vld [vmem:[#allocation8 + $0x20] sm:$0xff] (%p348_p2)   ;;  %v367_v5 = vld [vmem:[#allocation8 + $0x28] sm:$0xff] (%p348_p2)  }
  0x37   : > { %375 = vst [vmem:[#allocation2 + $0x8] sm:$0xff] (%p348_p2), %v359_v1   ;;  %v369_v6 = vld [vmem:[#allocation8 + $0x30] sm:$0xff] (%p348_p2)   ;;  %v371_v7 = vld [vmem:[#allocation8 + $0x38] sm:$0xff] (%p348_p2)  }
  0x38   : > { %377 = vst [vmem:[#allocation2 + $0x10] sm:$0xff] (%p348_p2), %v361_v2  }
  0x39   : > { %379 = vst [vmem:[#allocation2 + $0x18] sm:$0xff] (%p348_p2), %v363_v3  }
  0x3a   : > { %381 = vst [vmem:[#allocation2 + $0x20] sm:$0xff] (%p348_p2), %v365_v4  }
  0x3b   : > { %383 = vst [vmem:[#allocation2 + $0x28] sm:$0xff] %v367_v5  }
  0x3c   : > { %385 = vst [vmem:[#allocation2 + $0x30] sm:$0xff] %v369_v6  }
  0x3d   : > { %387 = vst [vmem:[#allocation2 + $0x38] sm:$0xff] %v371_v7  }
  0x3e   : > { %389 = vst [vmem:[#allocation13] sm:$0xff] %v1753_v8 }
  0x3f PF: > { %v1273_v9 = vld [vmem:[%s1913_s11 + $0x38] sm:$0xff]  ;;  %v1272_v10 = vld [vmem:[%s1913_s11 + $0x30] sm:$0xff]  ;;  %v1271_v11 = vld [vmem:[%s1913_s11 + $0x28] sm:$0xff]  ;;  %p1250_p1 = scmp.ne.s32.totalorder %s1738_s21, 3 }
  0x40   : > { %1384 = vmatpush.bf16.msra.mxu2 %v1273_v9  ;;  %526 = vmatpush.bf16.msra.mxu0 %v1273_v9  ;;  %v1270_v12 = vld [vmem:[%s1913_s11 + $0x20] sm:$0xff]  ;;  %v1269_v13 = vld [vmem:[%s1913_s11 + $0x18] sm:$0xff]  ;;  %v1268_v14 = vld [vmem:[%s1913_s11 + $0x10] sm:$0xff] }
  0x41   : > { %v1267_v15 = vld [vmem:[%s1913_s11 + $0x8] sm:$0xff]  ;;  %v1266_v16 = vld [vmem:[%s1913_s11] sm:$0xff]  ;;  %v1276_v61 = vld [vmem:[#allocation5 + $0x10] sm:$0xff] }
  0x42   : > { %v1258_v18 = vld [vmem:[#allocation2] sm:$0xff]  ;;  %v1259_v20 = vld [vmem:[#allocation2 + $0x8] sm:$0xff]  ;;  %v1280_v62 = vld [vmem:[#allocation5 + $0x30] sm:$0xff] }
  0x43   : > { %v1264_v21 = vld [vmem:[#allocation2 + $0x30] sm:$0xff]  ;;  %v1274_v57 = vld [vmem:[#allocation5] sm:$0xff]  ;;  %v1275_v59 = vld [vmem:[#allocation5 + $0x8] sm:$0xff] }
  0x44   : > { %1385 = vmatpush.bf16.msra.mxu2 %v1272_v10  ;;  %527 = vmatpush.bf16.msra.mxu0 %v1272_v10  ;;  %v1260_v22 = vld [vmem:[#allocation2 + $0x10] sm:$0xff]  ;;  %v1265_v23 = vld [vmem:[#allocation2 + $0x38] sm:$0xff]  ;;  %v1278_v58 = vld [vmem:[#allocation5 + $0x20] sm:$0xff] }
  0x45   : > { %v1262_v17 = vld [vmem:[#allocation2 + $0x20] sm:$0xff]  ;;  %v1261_v24 = vld [vmem:[#allocation2 + $0x18] sm:$0xff]  ;;  %v1279_v60 = vld [vmem:[#allocation5 + $0x28] sm:$0xff] }
  0x46   : > { %v1263_v19 = vld [vmem:[#allocation2 + $0x28] sm:$0xff]  ;;  %v1277_v63 = vld [vmem:[#allocation5 + $0x18] sm:$0xff]  ;;  %v1501_v2 = vld [vmem:[%s1919_s18] ss:$0 sm:$0xff] }
  0x47   : > { %v1281_v0 = vld [vmem:[#allocation5 + $0x38] sm:$0xff] }
  0x48   : > { %1386 = vmatpush.bf16.msra.mxu2 %v1271_v11  ;;  %528 = vmatpush.bf16.msra.mxu0 %v1271_v11 }
  0x4c   : > { %1387 = vmatpush.bf16.msra.mxu2 %v1270_v12  ;;  %529 = vmatpush.bf16.msra.mxu0 %v1270_v12 }
  0x50   : > { %1388 = vmatpush.bf16.msra.mxu2 %v1269_v13  ;;  %530 = vmatpush.bf16.msra.mxu0 %v1269_v13 }
  0x54   : > { %1389 = vmatpush.bf16.msra.mxu2 %v1268_v14  ;;  %531 = vmatpush.bf16.msra.mxu0 %v1268_v14 }
  0x58   : > { %1390 = vmatpush.bf16.msra.mxu2 %v1267_v15  ;;  %532 = vmatpush.bf16.msra.mxu0 %v1267_v15 }
  0x5c   : > { %1391 = vmatpush.bf16.msra.mxu2 %v1266_v16  ;;  %533 = vmatpush.bf16.msra.mxu0 %v1266_v16 }
  0x5f   : > { %554 = vmatmul.bf16.vlgmr.msra.gmra.mxu2 %v1262_v17  ;;  %534 = vmatmul.bf16.vlgmr.msra.gmra.mxu0 %v1258_v18 }
  0x6f   : > { %559 = vmatmul.bf16.gmra.mxu2 %v1263_v19  ;;  %539 = vmatmul.bf16.gmra.mxu0 %v1259_v20 }
  0x7f   : > { %564 = vmatmul.bf16.gmra.mxu2 %v1264_v21  ;;  %544 = vmatmul.bf16.gmra.mxu0 %v1260_v22 }
  0x8f   : > { %569 = vmatmul.bf16.gmra.mxu2 %v1265_v23  ;;  %549 = vmatmul.bf16.gmra.mxu0 %v1261_v24 }
  0xdc   : > { %v535_v25 = vpop.f32.mrf.mxu0 }
  0xe2   : > { %v555_v26 = vpop.f32.mrf.mxu2 }
  0xe4   : > { %v537_v27 = vpop.f32.mrf.mxu0 }
  0xe5   : > { %v1293_v28 = vpack.c.bf16 %v537_v27, %v535_v25 }
  0xe7   : > { %1294 = vst [vmem:[#allocation3 + $0x30] sm:$0xff] %v1293_v28  }
  0xea   : > { %v557_v29 = vpop.f32.mrf.mxu2 }
  0xeb   : > { %v1313_v30 = vpack.c.bf16 %v557_v29, %v555_v26 }
  0xec   : > { %v540_v31 = vpop.f32.mrf.mxu0 }
  0xed   : > { %1373 = vst [vmem:[#allocation3 + $0x8] sm:$0xff] %v1313_v30  }
  0xee   : > { %v1282_v56 = vld [vmem:[#allocation3 + $0x30] sm:$0xff] }
  0xf2   : > { %v560_v32 = vpop.f32.mrf.mxu2 }
  0xf4   : > { %v542_v33 = vpop.f32.mrf.mxu0  ;;  %v1286_v52 = vld [vmem:[#allocation3 + $0x8] sm:$0xff] }
  0xf5   : > { %v1298_v34 = vpack.c.bf16 %v542_v33, %v540_v31 }
  0xf7   : > { %1370 = vst [vmem:[#allocation3] sm:$0xff] %v1298_v34  }
  0xfa   : > { %v562_v35 = vpop.f32.mrf.mxu2 }
  0xfb   : > { %v1318_v36 = vpack.c.bf16 %v562_v35, %v560_v32 }
  0xfc   : > { %v545_v37 = vpop.f32.mrf.mxu0 }
  0xfd   : > { %1374 = vst [vmem:[#allocation3 + $0x20] sm:$0xff] %v1318_v36  }
  0xfe   : > { %v1283_v55 = vld [vmem:[#allocation3] sm:$0xff] }
 0x102   : > { %v565_v38 = vpop.f32.mrf.mxu2 }
 0x104   : > { %v547_v39 = vpop.f32.mrf.mxu0  ;;  %v1287_v51 = vld [vmem:[#allocation3 + $0x20] sm:$0xff] }
 0x105   : > { %v1303_v40 = vpack.c.bf16 %v547_v39, %v545_v37 }
 0x107   : > { %1371 = vst [vmem:[#allocation3 + $0x18] sm:$0xff] %v1303_v40  }
 0x10a   : > { %v567_v41 = vpop.f32.mrf.mxu2 }
 0x10b   : > { %v1323_v42 = vpack.c.bf16 %v567_v41, %v565_v38 }
 0x10c   : > { %v550_v43 = vpop.f32.mrf.mxu0 }
 0x10d   : > { %1375 = vst [vmem:[#allocation3 + $0x28] sm:$0xff] %v1323_v42  }
 0x10e   : > { %v1284_v54 = vld [vmem:[#allocation3 + $0x18] sm:$0xff] }
 0x112   : > { %v570_v44 = vpop.f32.mrf.mxu2 }
 0x114   : > { %v552_v45 = vpop.f32.mrf.mxu0  ;;  %v1288_v50 = vld [vmem:[#allocation3 + $0x28] sm:$0xff] }
 0x115   : > { %v1308_v46 = vpack.c.bf16 %v552_v45, %v550_v43 }
 0x117   : > { %1372 = vst [vmem:[#allocation3 + $0x10] sm:$0xff] %v1308_v46  }
 0x11a   : > { %v572_v47 = vpop.f32.mrf.mxu2 }
 0x11b   : > { %v1328_v48 = vpack.c.bf16 %v572_v47, %v570_v44 }
 0x11d   : > { %1376 = vst [vmem:[#allocation3 + $0x38] sm:$0xff] %v1328_v48  }
 0x11e   : > { %v1285_v53 = vld [vmem:[#allocation3 + $0x10] sm:$0xff] }
 0x124   : > { %v1289_v49 = vld [vmem:[#allocation3 + $0x38] sm:$0xff] }
 0x125   : > { %776 = vmatpush.bf16.msra.mxu1 %v1289_v49  ;;  %1392 = vmatpush.bf16.msra.mxu3 %v1289_v49 }
 0x129   : > { %777 = vmatpush.bf16.msra.mxu1 %v1288_v50  ;;  %1393 = vmatpush.bf16.msra.mxu3 %v1288_v50 }
 0x12d   : > { %778 = vmatpush.bf16.msra.mxu1 %v1287_v51  ;;  %1394 = vmatpush.bf16.msra.mxu3 %v1287_v51 }
 0x131   : > { %779 = vmatpush.bf16.msra.mxu1 %v1286_v52  ;;  %1395 = vmatpush.bf16.msra.mxu3 %v1286_v52 }
 0x135   : > { %780 = vmatpush.bf16.msra.mxu1 %v1285_v53  ;;  %1396 = vmatpush.bf16.msra.mxu3 %v1285_v53 }
 0x139   : > { %781 = vmatpush.bf16.msra.mxu1 %v1284_v54  ;;  %1397 = vmatpush.bf16.msra.mxu3 %v1284_v54 }
 0x13d   : > { %782 = vmatpush.bf16.msra.mxu1 %v1283_v55  ;;  %1398 = vmatpush.bf16.msra.mxu3 %v1283_v55 }
 0x141   : > { %783 = vmatpush.bf16.msra.mxu1 %v1282_v56  ;;  %1399 = vmatpush.bf16.msra.mxu3 %v1282_v56 }
 0x144   : > { %784 = vmatmul.bf16.vlgmr.msra.gmra.mxu1 %v1274_v57  ;;  %804 = vmatmul.bf16.vlgmr.msra.gmra.mxu3 %v1278_v58 }
 0x154   : > { %789 = vmatmul.bf16.gmra.mxu1 %v1275_v59  ;;  %809 = vmatmul.bf16.gmra.mxu3 %v1279_v60 }
 0x164   : > { %794 = vmatmul.bf16.gmra.mxu1 %v1276_v61  ;;  %814 = vmatmul.bf16.gmra.mxu3 %v1280_v62 }
 0x174   : > { %799 = vmatmul.bf16.gmra.mxu1 %v1277_v63  ;;  %819 = vmatmul.bf16.gmra.mxu3 %v1281_v0 }
 0x1c1   : > { %v785_v1 = vpop.f32.mrf.mxu1 }
 0x1c2   : > { %v1935_v4 = vadd.f32 %v1501_v2, %v785_v1 }
 0x1c4   : > { %v896_v7 = vmax.f32 %v1935_v4, 0.0 }
 0x1c7   : > { %v805_v3 = vpop.f32.mrf.mxu3 }
 0x1c8   : > { %v1941_v9 = vadd.f32 %v1501_v2, %v805_v3 }
 0x1c9   : > { %v787_v5 = vpop.f32.mrf.mxu1 }
 0x1ca   : > { %v1937_v6 = vadd.f32 %v1501_v2, %v787_v5  ;;  %v904_v14 = vmax.f32 %v1941_v9, 0.0 }
 0x1cc   : > { %v897_v8 = vmax.f32 %v1937_v6, 0.0 }
 0x1ce   : > { %v1333_v10 = vpack.c.bf16 %v897_v8, %v896_v7 }
 0x1cf   : > { %v807_v11 = vpop.f32.mrf.mxu3 }
 0x1d0   : > { %1334 = vst [vmem:[#allocation2] sm:$0xff] %v1333_v10   ;;  %v889_v12 = vadd.f32 %v1501_v2, %v807_v11 }
 0x1d1   : > { %v790_v13 = vpop.f32.mrf.mxu1 }
 0x1d2   : > { %v905_v15 = vmax.f32 %v889_v12, 0.0  ;;  %v882_v18 = vadd.f32 %v1501_v2, %v790_v13 }
 0x1d4   : > { %v1353_v16 = vpack.c.bf16 %v905_v15, %v904_v14  ;;  %v898_v21 = vmax.f32 %v882_v18, 0.0 }
 0x1d6   : > { %1380 = vst [vmem:[#allocation2 + $0x20] sm:$0xff] %v1353_v16  }
 0x1d7   : > { %v810_v17 = vpop.f32.mrf.mxu3 }
 0x1d8   : > { %v890_v23 = vadd.f32 %v1501_v2, %v810_v17 }
 0x1d9   : > { %v792_v19 = vpop.f32.mrf.mxu1 }
 0x1da   : > { %v883_v20 = vadd.f32 %v1501_v2, %v792_v19  ;;  %v906_v28 = vmax.f32 %v890_v23, 0.0 }
 0x1dc   : > { %v899_v22 = vmax.f32 %v883_v20, 0.0 }
 0x1de   : > { %v1338_v24 = vpack.c.bf16 %v899_v22, %v898_v21 }
 0x1df   : > { %v812_v25 = vpop.f32.mrf.mxu3 }
 0x1e0   : > { %1377 = vst [vmem:[#allocation2 + $0x8] sm:$0xff] %v1338_v24   ;;  %v891_v26 = vadd.f32 %v1501_v2, %v812_v25 }
 0x1e1   : > { %v795_v27 = vpop.f32.mrf.mxu1 }
 0x1e2   : > { %v907_v29 = vmax.f32 %v891_v26, 0.0  ;;  %v884_v32 = vadd.f32 %v1501_v2, %v795_v27 }
 0x1e4   : > { %v1358_v30 = vpack.c.bf16 %v907_v29, %v906_v28  ;;  %v900_v35 = vmax.f32 %v884_v32, 0.0 }
 0x1e6   : > { %1381 = vst [vmem:[#allocation2 + $0x28] sm:$0xff] %v1358_v30  }
 0x1e7   : > { %v815_v31 = vpop.f32.mrf.mxu3 }
 0x1e8   : > { %v892_v37 = vadd.f32 %v1501_v2, %v815_v31 }
 0x1e9   : > { %v797_v33 = vpop.f32.mrf.mxu1 }
 0x1ea   : > { %v885_v34 = vadd.f32 %v1501_v2, %v797_v33  ;;  %v908_v42 = vmax.f32 %v892_v37, 0.0 }
 0x1ec   : > { %v901_v36 = vmax.f32 %v885_v34, 0.0 }
 0x1ee   : > { %v1343_v38 = vpack.c.bf16 %v901_v36, %v900_v35 }
 0x1ef   : > { %v817_v39 = vpop.f32.mrf.mxu3 }
 0x1f0   : > { %1378 = vst [vmem:[#allocation2 + $0x10] sm:$0xff] %v1343_v38   ;;  %v893_v40 = vadd.f32 %v1501_v2, %v817_v39 }
 0x1f1   : > { %v800_v41 = vpop.f32.mrf.mxu1 }
 0x1f2   : > { %v909_v43 = vmax.f32 %v893_v40, 0.0  ;;  %v886_v46 = vadd.f32 %v1501_v2, %v800_v41 }
 0x1f4   : > { %v1363_v44 = vpack.c.bf16 %v909_v43, %v908_v42  ;;  %v902_v49 = vmax.f32 %v886_v46, 0.0 }
 0x1f6   : > { %1382 = vst [vmem:[#allocation2 + $0x30] sm:$0xff] %v1363_v44  }
 0x1f7   : > { %v820_v45 = vpop.f32.mrf.mxu3 }
 0x1f8   : > { %v894_v51 = vadd.f32 %v1501_v2, %v820_v45 }
 0x1f9   : > { %v802_v47 = vpop.f32.mrf.mxu1 }
 0x1fa   : > { %v887_v48 = vadd.f32 %v1501_v2, %v802_v47  ;;  %v910_v55 = vmax.f32 %v894_v51, 0.0 }
 0x1fc   : > { %v903_v50 = vmax.f32 %v887_v48, 0.0 }
 0x1fe   : > { %v1348_v52 = vpack.c.bf16 %v903_v50, %v902_v49 }
 0x1ff   : > { %v822_v53 = vpop.f32.mrf.mxu3 }
 0x200   : > { %1379 = vst [vmem:[#allocation2 + $0x18] sm:$0xff] %v1348_v52   ;;  %v895_v54 = vadd.f32 %v1501_v2, %v822_v53 }
 0x202   : > { %v911_v56 = vmax.f32 %v895_v54, 0.0  ;;  %952 = sbr.rel (%p1250_p1) target bundleno = 679 (0x2a7), region = 80 }
 0x204   : > { %v1368_v57 = vpack.c.bf16 %v911_v56, %v910_v55 }
 0x206   : > { %1383 = vst [vmem:[#allocation2 + $0x38] sm:$0xff] %v1368_v57  }
 0x207   : > { %955 = vmatpush.msra.mxu0 %v911_v56  ;;  %v954_v58 = vld [vmem:[#allocation12] sm:$0xff]  ;;  %v953_v59 = vld [vmem:[#allocation13] sm:$0xff] }
 0x209   : > { %956 = vmatpush.msra.mxu0 %v910_v55 }
 0x20b   : > { %957 = vmatpush.msra.mxu0 %v909_v43 }
 0x20d   : > { %958 = vmatpush.msra.mxu0 %v908_v42 }
 0x20f   : > { %959 = vmatpush.msra.mxu0 %v907_v29 }
 0x211   : > { %960 = vmatpush.msra.mxu0 %v906_v28 }
 0x213   : > { %961 = vmatpush.msra.mxu0 %v905_v15 }
 0x215   : > { %962 = vmatpush.msra.mxu0 %v904_v14 }
 0x217   : > { %963 = vmatpush.msra.mxu0 %v903_v50 }
 0x219   : > { %964 = vmatpush.msra.mxu0 %v902_v49 }
 0x21b   : > { %965 = vmatpush.msra.mxu0 %v901_v36 }
 0x21d   : > { %966 = vmatpush.msra.mxu0 %v900_v35 }
 0x21f   : > { %967 = vmatpush.msra.mxu0 %v899_v22 }
 0x221   : > { %968 = vmatpush.msra.mxu0 %v898_v21 }
 0x223   : > { %969 = vmatpush.msra.mxu0 %v897_v8 }
 0x225   : > { %970 = vmatpush.msra.mxu0 %v896_v7 }
 0x226   : > { %971 = vmatmul.f32.vlgmr.msra.gmra.mxu0 %v954_v58 }
 0x2a3   : > { %v972_v60 = vpop.f32.mrf.mxu0 }
 0x2a4   : > { %v975_v61 = vadd.f32 %v972_v60, %v953_v59 }
 0x2a6   : > { %976 = vst [vmem:[#allocation13] sm:$0xff] %v975_v61 }
 0x2a7 PF: > { %p1444_p3 = scmp.eq.s32.totalorder %s1814_s24, 3  ;;  %s985_s27 = sshll.u32 %s1980_s5, 4  ;;  %s986_s27 = int_to_ptr.hbm [resolvable:$true] %s985_s27 }
 0x2a8   : > { %s1754_s13 = smov [#allocation13]  }
 0x2a9   : > { %s983_s26 = sshll.u32 %s1754_s13, 4  ;;  %s984_s26 = int_to_ptr.vmem [resolvable:$true] %s983_s26 }
 0x2aa   : > { %1417 = dma.vmem_to_hbm [thread:$0]  (%p1444_p3), %s984_s26, 128, %s986_s27, [#allocation7]  }
 0x2ab   : > { %1721 = dma.done.wait (%p1444_p3), [#allocation7], 128  }
 0x2ac   : > { %1723 = vsyncadd (%p1444_p3), [#allocation7], 4294967168 }
 0x2ad PF: > { %s18_s23 = sadd.s32 1, %s1746_s23   ;;  %s1996_s18 = smov %s1730_s19 }
 0x2ae   : > { %p15_p4 = scmp.ge.s32.totalorder %s18_s23, 6   ;;  %s1997_s19 = smov %s1734_s20 }
 0x2af   : > { %s1998_s20 = smov %s1872_s6  ;;  %s1999_s21 = smov %s1742_s22 }
 0x2b0   : > { %s2000_s22 = smov %s2002_s15  ;;  %17 = sbr.rel (!%p15_p4) target bundleno = 9 (0x9), region = 125 }
 0x2b5   :  { %999 = vsyncpa [#allocation6], 1 }
 0x2b6   :  { %1001 = vsyncpa [#allocation6 + $0x1], 1 }
 0x2b7   :  { %1002 = vsyncpa [#allocation9], 1 }
 0x2b8   :  { %1003 = vsyncpa [#allocation7], 1 }
 0x2b9   :  { %1005 = vsyncpa [#allocation7 + $0x1], 1 }

</bundles_post_ra>
